<compile_context>
chip_gen: v6e
topology: v6e:2x2x1
jax: 0.10.0
libtpu: 0.0.40
codegen_flags: <defaults>
</compile_context>

<pallas_src>
import jax
import jax.numpy as jnp
from jax.experimental import pallas as pl
from jax.experimental.pallas import tpu as pltpu


# ---------------------------------------------------------------------------
# helpers
# ---------------------------------------------------------------------------
def _round_up(x, m):
    return ((x + m - 1) // m) * m


def _vmem_cap_bytes():
    """~90% of this chip's physical VMEM (64 MiB fallback -> v7x-safe)."""
    try:
        info = pltpu.get_tpu_info()
        cap = int(getattr(info, "vmem_capacity_bytes", 64 << 20))
    except Exception:
        cap = 64 << 20
    return max(32 << 20, (cap * 9) // 10)


def _choose_tiling(batch, dp, hp, lp2):
    """Pick (tb, dk): batch tile and K tile of the first matmul.

    dk keeps the resident/streamed W1 blocks within a v7x-safe VMEM budget;
    tb is 16-aligned (bf16 sublane pairs after the in-kernel cast), capped at
    1024 rows, balanced against tail waste, and split so large batches give
    >= 2 grid steps (v7x dual TensorCore).
    """
    # --- K tiling of the first matmul (W1 streamed in (dk, hp) blocks) ---
    w1_budget = 20 << 20                       # bytes of W1 blocks kept in VMEM
    dk = dp
    if dp * hp * 2 > w1_budget:                # bf16 W1 too big to keep resident
        n128 = dp // 128
        g_cap = max(1, w1_budget // (2 * 2 * hp * 128))   # double-buffered blocks
        g = 1
        for cand in range(1, n128 + 1):
            if n128 % cand == 0 and cand <= g_cap:
                g = cand
        dk = 128 * g

    # --- batch tile ---
    # per-row VMEM bytes that scale with tb: x (f32, 2 buffers), accumulator,
    # out/eps blocks, fused-head temporaries, bf16 hidden copy.
    per_row = dk * 4 * 2 + hp * 4 + lp2 * 4 * 3 + hp * 2
    cap = max(16, ((20 << 20) // per_row) // 16 * 16)

    if batch <= 16:
        return batch, dk                      # full-extent batch block

    full16 = (batch // 16) * 16               # largest 16-multiple <= batch
    tb = min(1024, cap, full16)
    steps = pl.cdiv(batch, tb)
    if steps == 1 and batch >= 512:
        steps = 2                             # v7x: give both TensorCores a block
    tb = min(tb, _round_up(pl.cdiv(batch, steps), 16), full16)
    # avoid pathological tail waste (> ~12.5% of the batch)
    while tb > 16 and (pl.cdiv(batch, tb) * tb - batch) * 8 > batch:
        tb -= 16
    return max(tb, 16), dk


# ---------------------------------------------------------------------------
# Pallas kernels  (grid = (batch tiles, K tiles); K is the reduction axis)
# ---------------------------------------------------------------------------
def _mean_kernel(x_ref, w1_ref, b1_ref, wm_ref, bm_ref, out_ref, acc_ref):
    k = pl.program_id(1)

    @pl.when(k == 0)
    def _init():
        acc_ref[...] = jnp.zeros_like(acc_ref)

    # partial first matmul: x (f32, cast on-chip to bf16) @ W1 block -> f32 acc
    acc_ref[...] += jnp.dot(x_ref[...].astype(jnp.bfloat16), w1_ref[...],
                            preferred_element_type=jnp.float32)

    @pl.when(k == pl.num_programs(1) - 1)
    def _finalize():
        h = jnp.maximum(acc_ref[...] + b1_ref[...], 0.0).astype(jnp.bfloat16)
        mu = jnp.dot(h, wm_ref[...], preferred_element_type=jnp.float32) + bm_ref[...]
        out_ref[...] = mu.astype(out_ref.dtype)


def _sample_kernel(x_ref, w1_ref, b1_ref, wh_ref, bh_ref, eps_ref, out_ref, acc_ref):
    k = pl.program_id(1)

    @pl.when(k == 0)
    def _init():
        acc_ref[...] = jnp.zeros_like(acc_ref)

    acc_ref[...] += jnp.dot(x_ref[...].astype(jnp.bfloat16), w1_ref[...],
                            preferred_element_type=jnp.float32)

    @pl.when(k == pl.num_programs(1) - 1)
    def _finalize():
        h = jnp.maximum(acc_ref[...] + b1_ref[...], 0.0).astype(jnp.bfloat16)
        # fused heads: one (H, 2*Lp) matmul -> [mu | logvar], split on a
        # 128-lane-aligned boundary (Lp is a multiple of 128).
        heads = jnp.dot(h, wh_ref[...], preferred_element_type=jnp.float32) + bh_ref[...]
        lp = out_ref.shape[-1]
        mu = heads[:, :lp]
        logvar = heads[:, lp:]
        # fused reparameterize epilogue: z = mu + eps * exp(0.5 * logvar)
        out_ref[...] = (mu + eps_ref[...] * jnp.exp(0.5 * logvar)).astype(out_ref.dtype)


# ---------------------------------------------------------------------------
# pallas_call builder
# ---------------------------------------------------------------------------
def _encoder_pallas_call(x, eps, w1, b1, wh, bh, lp, tb, dk, buffered_weights):
    b, dp = x.shape
    hp = w1.shape[1]
    lp2 = wh.shape[1]
    kt = dp // dk
    bt = pl.cdiv(b, tb)
    sample = eps is not None

    def resident(shape):
        # grid-invariant operand: single buffer instead of default double buffer
        if buffered_weights:
            return pl.BlockSpec(shape, lambda i, k: (0, 0), pipeline_mode=pl.Buffered(1))
        return pl.BlockSpec(shape, lambda i, k: (0, 0))

    w1_spec = (pl.BlockSpec((dk, hp), lambda i, k: (k, 0)) if kt > 1
               else resident((dk, hp)))
    in_specs = [
        pl.BlockSpec((tb, dk), lambda i, k: (i, k)),   # x streamed f32, cast in-kernel
        w1_spec,
        resident((1, hp)),
        resident((hp, lp2)),
        resident((1, lp2)),
    ]
    args = [x, w1, b1, wh, bh]
    if sample:
        in_specs.append(pl.BlockSpec((tb, lp), lambda i, k: (i, 0)))  # eps tile
        args.append(eps)
        kernel = _sample_kernel
    else:
        kernel = _mean_kernel

    # VMEM limit derived from the actual block sizes, clamped to chip capacity.
    vmem_need = (
        tb * dk * 4 * 2                                          # x blocks (2 bufs, f32)
        + dk * hp * 2 * (2 if kt > 1 else (1 if buffered_weights else 2))
        + hp * lp2 * 2 + (hp + lp2) * 4                          # head weights + biases
        + tb * hp * 4                                            # f32 accumulator scratch
        + tb * lp * 4 * 2                                        # output blocks
        + (tb * lp * 4 * 2 if sample else 0)                     # eps blocks
        + tb * lp2 * 4 + tb * hp * 2                             # in-kernel temporaries
    )
    vmem_limit = min(_vmem_cap_bytes(), max(32 << 20, int(vmem_need * 1.25) + (2 << 20)))

    flops = 2 * b * dp * hp + 2 * b * hp * lp2 + (3 * b * lp if sample else 0)
    bytes_accessed = (x.size * 4 + w1.size * 2 + wh.size * 2 + (b1.size + bh.size) * 4
                      + (eps.size * 4 if sample else 0) + b * lp * 4)

    return pl.pallas_call(
        kernel,
        out_shape=jax.ShapeDtypeStruct((b, lp), jnp.float32),
        grid_spec=pltpu.PrefetchScalarGridSpec(
            num_scalar_prefetch=0,
            grid=(bt, kt),
            in_specs=in_specs,
            out_specs=pl.BlockSpec((tb, lp), lambda i, k: (i, 0)),
            scratch_shapes=[pltpu.VMEM((tb, hp), jnp.float32)],
        ),
        compiler_params=pltpu.CompilerParams(
            dimension_semantics=("parallel", "arbitrary"),
            vmem_limit_bytes=vmem_limit,
        ),
        cost_estimate=pl.CostEstimate(flops=flops,
                                      transcendentals=(b * lp if sample else 0),
                                      bytes_accessed=bytes_accessed),
    )(*args)


# Single-buffered resident weights via pipeline_mode=pl.Buffered(1); fall back
# to default double buffering if this JAX build does not lower pipeline_mode.
_BUFFERED_WEIGHTS_OK = hasattr(pl, "Buffered")


def _run_encoder(x, eps, w1, b1, wh, bh, lp, tb, dk):
    global _BUFFERED_WEIGHTS_OK
    if _BUFFERED_WEIGHTS_OK:
        try:
            return _encoder_pallas_call(x, eps, w1, b1, wh, bh, lp, tb, dk, True)
        except Exception:
            _BUFFERED_WEIGHTS_OK = False
    return _encoder_pallas_call(x, eps, w1, b1, wh, bh, lp, tb, dk, False)


# ---------------------------------------------------------------------------
# Module wrapper
# ---------------------------------------------------------------------------
class RepresentationExtractor:
    VALID_MODES = ["mean", "sample"]

    def __init__(self, params, mode="mean"):
        assert mode in self.VALID_MODES, f"`mode` must be one of {self.VALID_MODES}"
        self.mode = mode
        d_in, hidden = params["w1"].shape
        latent = params["w_mu"].shape[1]
        self.d_in, self.hidden, self.latent = d_in, hidden, latent
        # lane-aligned padded feature dims (zero padding -> results exact)
        self.dp = _round_up(d_in, 128)
        self.hp = _round_up(hidden, 128)
        self.lp = _round_up(latent, 128)

        def pad2(a, shape):
            a = jnp.asarray(a, jnp.float32)
            out = jnp.zeros(shape, jnp.float32)
            return out.at[:a.shape[0], :a.shape[1]].set(a)

        # bf16 MXU operands; biases stay f32 (padded once, host side).
        self.w1 = pad2(params["w1"], (self.dp, self.hp)).astype(jnp.bfloat16)
        self.b1 = pad2(params["b1"], (1, self.hp))
        if mode == "mean":
            self.w_head = pad2(params["w_mu"], (self.hp, self.lp)).astype(jnp.bfloat16)
            self.b_head = pad2(params["b_mu"], (1, self.lp))
        else:
            w_mu = pad2(params["w_mu"], (self.hp, self.lp))
            w_lv = pad2(params["w_lv"], (self.hp, self.lp))
            self.w_head = jnp.concatenate([w_mu, w_lv], axis=1).astype(jnp.bfloat16)
            self.b_head = jnp.concatenate([pad2(params["b_mu"], (1, self.lp)),
                                           pad2(params["b_lv"], (1, self.lp))], axis=1)
        self.lp2 = self.w_head.shape[1]

    def __call__(self, x_nchw, key=None):
        b = x_nchw.shape[0]
        # flatten like torch .view(B, -1); streamed into the kernel as f32 and
        # cast to bf16 on-chip -> no host-side padded bf16 copy of x, and no
        # batch padding (partial tail block handled by the cdiv grid).
        x = x_nchw.reshape(b, -1).astype(jnp.float32)
        if self.d_in != self.dp:
            # rare: feature dim not lane-aligned (D = C*H*W usually is)
            x = jnp.pad(x, ((0, 0), (0, self.dp - self.d_in)))
        tb, dk = _choose_tiling(b, self.dp, self.hp, self.lp2)

        if self.mode == "mean":
            out = _run_encoder(x, None, self.w1, self.b1,
                               self.w_head, self.b_head, self.lp, tb, dk)
        elif self.mode == "sample":
            assert key is not None, "mode='sample' requires a PRNG key"
            # eps ~ N(0, I) (torch.randn_like): drawn directly at the lane-padded
            # width so no pad materialization; extra columns are discarded with
            # the padded output columns.
            # TODO(synk): pltpu.prng_seed + pltpu.stateful_normal would remove the
            # eps HBM stream entirely but changes the random stream vs jax.random.
            eps = jax.random.normal(key, (b, self.lp), jnp.float32)
            out = _run_encoder(x, eps, self.w1, self.b1,
                               self.w_head, self.b_head, self.lp, tb, dk)
        else:
            raise NotImplementedError
        return out[:, :self.latent]


def init_params(key, d_in, hidden, latent):
    k1, k2, k3 = jax.random.split(key, 3)
    scale1 = 1.0 / jnp.sqrt(d_in)
    scale2 = 1.0 / jnp.sqrt(hidden)
    return {
        "w1":   jax.random.normal(k1, (d_in, hidden), jnp.float32) * scale1,
        "b1":   jnp.zeros((1, hidden), jnp.float32),
        "w_mu": jax.random.normal(k2, (hidden, latent), jnp.float32) * scale2,
        "b_mu": jnp.zeros((1, latent), jnp.float32),
        "w_lv": jax.random.normal(k3, (hidden, latent), jnp.float32) * scale2,
        "b_lv": jnp.zeros((1, latent), jnp.float32),
    }


if __name__ == "__main__":
    B, C, Himg, Wimg = 2, 4, 16, 16          # NCHW input
    D = C * Himg * Wimg                      # 1024
    HIDDEN, LATENT = 32, 8

    root = jax.random.PRNGKey(0)
    kx, kp, ke = jax.random.split(root, 3)

    x = jax.random.normal(kx, (B, C, Himg, Wimg), jnp.float32)
    params = init_params(kp, D, HIDDEN, LATENT)

    # mode='mean' -> mu
    extractor_mean = RepresentationExtractor(params, mode="mean")
    mu = jax.block_until_ready(extractor_mean(x))

    # mode='sample' -> mu + eps * exp(0.5 * logvar)
    extractor_sample = RepresentationExtractor(params, mode="sample")
    z = jax.block_until_ready(extractor_sample(x, key=ke))

    # plain-JAX reference (mimics the kernel's bf16 MXU operands / f32 accumulation)
    def q(a):
        return a.astype(jnp.bfloat16).astype(jnp.float32)

    x_flat = x.reshape(B, -1)
    h_ref = jnp.maximum(q(x_flat) @ q(params["w1"]) + params["b1"], 0.0)
    mu_ref = q(h_ref) @ q(params["w_mu"]) + params["b_mu"]
    lv_ref = q(h_ref) @ q(params["w_lv"]) + params["b_lv"]
    eps_ref = jax.random.normal(ke, (B, extractor_sample.lp), jnp.float32)[:, :LATENT]
    z_ref = mu_ref + eps_ref * jnp.exp(0.5 * lv_ref)

    assert mu.shape == (B, LATENT) and z.shape == (B, LATENT)
    assert jnp.allclose(mu, mu_ref, atol=1e-2, rtol=1e-2)
    assert jnp.allclose(z, z_ref, atol=1e-2, rtol=1e-2)
    print("KERNEL_OK")
</pallas_src>

<mosaic_0001>
module attributes {stable_mosaic.version = 11 : i64} {
  func.func @_mean_kernel(%arg0: i32, %arg1: i32, %arg2: memref<2x1024xf32, #tpu.memory_space<vmem>>, %arg3: memref<1024x128xbf16, #tpu.memory_space<vmem>>, %arg4: memref<1x128xf32, #tpu.memory_space<vmem>>, %arg5: memref<128x128xbf16, #tpu.memory_space<vmem>>, %arg6: memref<1x128xf32, #tpu.memory_space<vmem>>, %arg7: memref<2x128xf32, #tpu.memory_space<vmem>>, %arg8: memref<2x128xf32, #tpu.memory_space<vmem>>) attributes {dimension_semantics = [#tpu.dimension_semantics<parallel>, #tpu.dimension_semantics<arbitrary>], iteration_bounds = array<i64: 1, 1>, scalar_prefetch = 0 : i64, scratch_operands = 1 : i64, tpu.core_type = #tpu.core_type<tc>, window_params = [{transform_indices = @transform_0, window_bounds = array<i64: 2, 1024>}, {pipeline_mode = #tpu.pipeline_mode<synchronous>, transform_indices = @transform_1, window_bounds = array<i64: 1024, 128>}, {pipeline_mode = #tpu.pipeline_mode<synchronous>, transform_indices = @transform_2, window_bounds = array<i64: 1, 128>}, {pipeline_mode = #tpu.pipeline_mode<synchronous>, transform_indices = @transform_3, window_bounds = array<i64: 128, 128>}, {pipeline_mode = #tpu.pipeline_mode<synchronous>, transform_indices = @transform_4, window_bounds = array<i64: 1, 128>}, {transform_indices = @transform_5, window_bounds = array<i64: 2, 128>}]} {
    %c0_i32 = arith.constant 0 : i32
    %0 = arith.cmpi eq, %arg1, %c0_i32 : i32
    %1 = arith.extui %0 : i1 to i32
    %c0_i32_0 = arith.constant 0 : i32
    %2 = arith.cmpi ne, %1, %c0_i32_0 : i32
    scf.if %2 {
      %cst_10 = arith.constant 0.000000e+00 : f32
      %13 = vector.broadcast %cst_10 : f32 to vector<2x128xf32>
      %c0_11 = arith.constant 0 : index
      %c0_12 = arith.constant 0 : index
      %14 = vector.load %arg8[%c0_11, %c0_12] : memref<2x128xf32, #tpu.memory_space<vmem>>, vector<2x128xf32>
      tpu.vector_store %arg8[%c0_11, %c0_12], %13 {strides = array<i32>} : memref<2x128xf32, #tpu.memory_space<vmem>>, vector<2x128xf32>,
    } else {
    }
    %c0 = arith.constant 0 : index
    %c0_1 = arith.constant 0 : index
    %3 = vector.load %arg8[%c0, %c0_1] : memref<2x128xf32, #tpu.memory_space<vmem>>, vector<2x128xf32>
    %c0_2 = arith.constant 0 : index
    %c0_3 = arith.constant 0 : index
    %4 = vector.load %arg2[%c0_2, %c0_3] : memref<2x1024xf32, #tpu.memory_space<vmem>>, vector<2x1024xf32>
    %5 = arith.truncf %4 : vector<2x1024xf32> to vector<2x1024xbf16>
    %c0_4 = arith.constant 0 : index
    %c0_5 = arith.constant 0 : index
    %6 = vector.load %arg3[%c0_4, %c0_5] : memref<1024x128xbf16, #tpu.memory_space<vmem>>, vector<1024x128xbf16>
    %cst = arith.constant dense<0.000000e+00> : vector<2x128xf32>
    %7 = tpu.matmul %5, %6, %cst {dimension_numbers = #tpu.dot_dimension_numbers<[1], [0], [0], [1], [0, 0, 1, 1], [], []>} : vector<2x1024xbf16>, vector<1024x128xbf16>, vector<2x128xf32> -> vector<2x128xf32>
    %8 = arith.addf %3, %7 : vector<2x128xf32>
    %c0_6 = arith.constant 0 : index
    %c0_7 = arith.constant 0 : index
    %9 = vector.load %arg8[%c0_6, %c0_7] : memref<2x128xf32, #tpu.memory_space<vmem>>, vector<2x128xf32>
    tpu.vector_store %arg8[%c0_6, %c0_7], %8 {strides = array<i32>} : memref<2x128xf32, #tpu.memory_space<vmem>>, vector<2x128xf32>,
    %c0_i32_8 = arith.constant 0 : i32
    %10 = arith.cmpi eq, %arg1, %c0_i32_8 : i32
    %11 = arith.extui %10 : i1 to i32
    %c0_i32_9 = arith.constant 0 : i32
    %12 = arith.cmpi ne, %11, %c0_i32_9 : i32
    scf.if %12 {
      %c0_10 = arith.constant 0 : index
      %c0_11 = arith.constant 0 : index
      %13 = vector.load %arg8[%c0_10, %c0_11] : memref<2x128xf32, #tpu.memory_space<vmem>>, vector<2x128xf32>
      %c0_12 = arith.constant 0 : index
      %c0_13 = arith.constant 0 : index
      %14 = vector.load %arg4[%c0_12, %c0_13] : memref<1x128xf32, #tpu.memory_space<vmem>>, vector<1x128xf32>
      %15 = vector.broadcast %14 : vector<1x128xf32> to vector<2x128xf32>
      %16 = arith.addf %13, %15 : vector<2x128xf32>
      %cst_14 = arith.constant 0.000000e+00 : f32
      %17 = vector.broadcast %cst_14 : f32 to vector<2x128xf32>
      %18 = arith.maximumf %16, %17 : vector<2x128xf32>
      %19 = arith.truncf %18 : vector<2x128xf32> to vector<2x128xbf16>
      %c0_15 = arith.constant 0 : index
      %c0_16 = arith.constant 0 : index
      %20 = vector.load %arg5[%c0_15, %c0_16] : memref<128x128xbf16, #tpu.memory_space<vmem>>, vector<128x128xbf16>
      %cst_17 = arith.constant dense<0.000000e+00> : vector<2x128xf32>
      %21 = tpu.matmul %19, %20, %cst_17 {dimension_numbers = #tpu.dot_dimension_numbers<[1], [0], [0], [1], [0, 0, 1, 1], [], []>} : vector<2x128xbf16>, vector<128x128xbf16>, vector<2x128xf32> -> vector<2x128xf32>
      %c0_18 = arith.constant 0 : index
      %c0_19 = arith.constant 0 : index
      %22 = vector.load %arg6[%c0_18, %c0_19] : memref<1x128xf32, #tpu.memory_space<vmem>>, vector<1x128xf32>
      %23 = vector.broadcast %22 : vector<1x128xf32> to vector<2x128xf32>
      %24 = arith.addf %21, %23 : vector<2x128xf32>
      %c0_20 = arith.constant 0 : index
      %c0_21 = arith.constant 0 : index
      %25 = vector.load %arg7[%c0_20, %c0_21] : memref<2x128xf32, #tpu.memory_space<vmem>>, vector<2x128xf32>
      tpu.vector_store %arg7[%c0_20, %c0_21], %24 {strides = array<i32>} : memref<2x128xf32, #tpu.memory_space<vmem>>, vector<2x128xf32>,
    } else {
    }
    return
  }
  func.func @transform_0(%arg0: i32, %arg1: i32) -> (i32, i32) {
    %c0_i32 = arith.constant 0 : i32
    return %arg0, %arg1 : i32, i32
  }
  func.func @transform_1(%arg0: i32, %arg1: i32) -> (i32, i32) {
    %c0_i32 = arith.constant 0 : i32
    %c0_i32_0 = arith.constant 0 : i32
    %c0_i32_1 = arith.constant 0 : i32
    return %c0_i32, %c0_i32_0 : i32, i32
  }
  func.func @transform_2(%arg0: i32, %arg1: i32) -> (i32, i32) {
    %c0_i32 = arith.constant 0 : i32
    %c0_i32_0 = arith.constant 0 : i32
    %c0_i32_1 = arith.constant 0 : i32
    return %c0_i32, %c0_i32_0 : i32, i32
  }
  func.func @transform_3(%arg0: i32, %arg1: i32) -> (i32, i32) {
    %c0_i32 = arith.constant 0 : i32
    %c0_i32_0 = arith.constant 0 : i32
    %c0_i32_1 = arith.constant 0 : i32
    return %c0_i32, %c0_i32_0 : i32, i32
  }
  func.func @transform_4(%arg0: i32, %arg1: i32) -> (i32, i32) {
    %c0_i32 = arith.constant 0 : i32
    %c0_i32_0 = arith.constant 0 : i32
    %c0_i32_1 = arith.constant 0 : i32
    return %c0_i32, %c0_i32_0 : i32, i32
  }
  func.func @transform_5(%arg0: i32, %arg1: i32) -> (i32, i32) {
    %c0_i32 = arith.constant 0 : i32
    %c0_i32_0 = arith.constant 0 : i32
    return %arg0, %c0_i32 : i32, i32
  }
}

module attributes {stable_mosaic.version = 11 : i64} {
  func.func @_mean_kernel(%arg0: i32, %arg1: i32, %arg2: memref<2x1024xf32, #tpu.memory_space<vmem>>, %arg3: memref<1024x128xbf16, #tpu.memory_space<vmem>>, %arg4: memref<1x128xf32, #tpu.memory_space<vmem>>, %arg5: memref<128x128xbf16, #tpu.memory_space<vmem>>, %arg6: memref<1x128xf32, #tpu.memory_space<vmem>>, %arg7: memref<2x128xf32, #tpu.memory_space<vmem>>, %arg8: memref<2x128xf32, #tpu.memory_space<vmem>>) attributes {dimension_semantics = [#tpu.dimension_semantics<parallel>, #tpu.dimension_semantics<arbitrary>], iteration_bounds = array<i64: 1, 1>, scalar_prefetch = 0 : i64, scratch_operands = 1 : i64, tpu.core_type = #tpu.core_type<tc>, window_params = [{transform_indices = @transform_0, window_bounds = array<i64: 2, 1024>}, {pipeline_mode = #tpu.pipeline_mode<synchronous>, transform_indices = @transform_1, window_bounds = array<i64: 1024, 128>}, {pipeline_mode = #tpu.pipeline_mode<synchronous>, transform_indices = @transform_2, window_bounds = array<i64: 1, 128>}, {pipeline_mode = #tpu.pipeline_mode<synchronous>, transform_indices = @transform_3, window_bounds = array<i64: 128, 128>}, {pipeline_mode = #tpu.pipeline_mode<synchronous>, transform_indices = @transform_4, window_bounds = array<i64: 1, 128>}, {transform_indices = @transform_5, window_bounds = array<i64: 2, 128>}]} {
    %c0_i32 = arith.constant 0 : i32
    %0 = arith.cmpi eq, %arg1, %c0_i32 : i32
    %1 = arith.extui %0 : i1 to i32
    %c0_i32_0 = arith.constant 0 : i32
    %2 = arith.cmpi ne, %1, %c0_i32_0 : i32
    scf.if %2 {
      %cst_10 = arith.constant 0.000000e+00 : f32
      %13 = vector.broadcast %cst_10 : f32 to vector<2x128xf32>
      %c0_11 = arith.constant 0 : index
      %c0_12 = arith.constant 0 : index
      %14 = vector.load %arg8[%c0_11, %c0_12] : memref<2x128xf32, #tpu.memory_space<vmem>>, vector<2x128xf32>
      tpu.vector_store %arg8[%c0_11, %c0_12], %13 {strides = array<i32>} : memref<2x128xf32, #tpu.memory_space<vmem>>, vector<2x128xf32>,
    } else {
    }
    %c0 = arith.constant 0 : index
    %c0_1 = arith.constant 0 : index
    %3 = vector.load %arg8[%c0, %c0_1] : memref<2x128xf32, #tpu.memory_space<vmem>>, vector<2x128xf32>
    %c0_2 = arith.constant 0 : index
    %c0_3 = arith.constant 0 : index
    %4 = vector.load %arg2[%c0_2, %c0_3] : memref<2x1024xf32, #tpu.memory_space<vmem>>, vector<2x1024xf32>
    %5 = arith.truncf %4 : vector<2x1024xf32> to vector<2x1024xbf16>
    %c0_4 = arith.constant 0 : index
    %c0_5 = arith.constant 0 : index
    %6 = vector.load %arg3[%c0_4, %c0_5] : memref<1024x128xbf16, #tpu.memory_space<vmem>>, vector<1024x128xbf16>
    %cst = arith.constant dense<0.000000e+00> : vector<2x128xf32>
    %7 = tpu.matmul %5, %6, %cst {dimension_numbers = #tpu.dot_dimension_numbers<[1], [0], [0], [1], [0, 0, 1, 1], [], []>} : vector<2x1024xbf16>, vector<1024x128xbf16>, vector<2x128xf32> -> vector<2x128xf32>
    %8 = arith.addf %3, %7 : vector<2x128xf32>
    %c0_6 = arith.constant 0 : index
    %c0_7 = arith.constant 0 : index
    %9 = vector.load %arg8[%c0_6, %c0_7] : memref<2x128xf32, #tpu.memory_space<vmem>>, vector<2x128xf32>
    tpu.vector_store %arg8[%c0_6, %c0_7], %8 {strides = array<i32>} : memref<2x128xf32, #tpu.memory_space<vmem>>, vector<2x128xf32>,
    %c0_i32_8 = arith.constant 0 : i32
    %10 = arith.cmpi eq, %arg1, %c0_i32_8 : i32
    %11 = arith.extui %10 : i1 to i32
    %c0_i32_9 = arith.constant 0 : i32
    %12 = arith.cmpi ne, %11, %c0_i32_9 : i32
    scf.if %12 {
      %c0_10 = arith.constant 0 : index
      %c0_11 = arith.constant 0 : index
      %13 = vector.load %arg8[%c0_10, %c0_11] : memref<2x128xf32, #tpu.memory_space<vmem>>, vector<2x128xf32>
      %c0_12 = arith.constant 0 : index
      %c0_13 = arith.constant 0 : index
      %14 = vector.load %arg4[%c0_12, %c0_13] : memref<1x128xf32, #tpu.memory_space<vmem>>, vector<1x128xf32>
      %15 = vector.broadcast %14 : vector<1x128xf32> to vector<2x128xf32>
      %16 = arith.addf %13, %15 : vector<2x128xf32>
      %cst_14 = arith.constant 0.000000e+00 : f32
      %17 = vector.broadcast %cst_14 : f32 to vector<2x128xf32>
      %18 = arith.maximumf %16, %17 : vector<2x128xf32>
      %19 = arith.truncf %18 : vector<2x128xf32> to vector<2x128xbf16>
      %c0_15 = arith.constant 0 : index
      %c0_16 = arith.constant 0 : index
      %20 = vector.load %arg5[%c0_15, %c0_16] : memref<128x128xbf16, #tpu.memory_space<vmem>>, vector<128x128xbf16>
      %cst_17 = arith.constant dense<0.000000e+00> : vector<2x128xf32>
      %21 = tpu.matmul %19, %20, %cst_17 {dimension_numbers = #tpu.dot_dimension_numbers<[1], [0], [0], [1], [0, 0, 1, 1], [], []>} : vector<2x128xbf16>, vector<128x128xbf16>, vector<2x128xf32> -> vector<2x128xf32>
      %c0_18 = arith.constant 0 : index
      %c0_19 = arith.constant 0 : index
      %22 = vector.load %arg6[%c0_18, %c0_19] : memref<1x128xf32, #tpu.memory_space<vmem>>, vector<1x128xf32>
      %23 = vector.broadcast %22 : vector<1x128xf32> to vector<2x128xf32>
      %24 = arith.addf %21, %23 : vector<2x128xf32>
      %c0_20 = arith.constant 0 : index
      %c0_21 = arith.constant 0 : index
      %25 = vector.load %arg7[%c0_20, %c0_21] : memref<2x128xf32, #tpu.memory_space<vmem>>, vector<2x128xf32>
      tpu.vector_store %arg7[%c0_20, %c0_21], %24 {strides = array<i32>} : memref<2x128xf32, #tpu.memory_space<vmem>>, vector<2x128xf32>,
    } else {
    }
    return
  }
  func.func @transform_0(%arg0: i32, %arg1: i32) -> (i32, i32) {
    %c0_i32 = arith.constant 0 : i32
    return %arg0, %arg1 : i32, i32
  }
  func.func @transform_1(%arg0: i32, %arg1: i32) -> (i32, i32) {
    %c0_i32 = arith.constant 0 : i32
    %c0_i32_0 = arith.constant 0 : i32
    %c0_i32_1 = arith.constant 0 : i32
    return %c0_i32, %c0_i32_0 : i32, i32
  }
  func.func @transform_2(%arg0: i32, %arg1: i32) -> (i32, i32) {
    %c0_i32 = arith.constant 0 : i32
    %c0_i32_0 = arith.constant 0 : i32
    %c0_i32_1 = arith.constant 0 : i32
    return %c0_i32, %c0_i32_0 : i32, i32
  }
  func.func @transform_3(%arg0: i32, %arg1: i32) -> (i32, i32) {
    %c0_i32 = arith.constant 0 : i32
    %c0_i32_0 = arith.constant 0 : i32
    %c0_i32_1 = arith.constant 0 : i32
    return %c0_i32, %c0_i32_0 : i32, i32
  }
  func.func @transform_4(%arg0: i32, %arg1: i32) -> (i32, i32) {
    %c0_i32 = arith.constant 0 : i32
    %c0_i32_0 = arith.constant 0 : i32
    %c0_i32_1 = arith.constant 0 : i32
    return %c0_i32, %c0_i32_0 : i32, i32
  }
  func.func @transform_5(%arg0: i32, %arg1: i32) -> (i32, i32) {
    %c0_i32 = arith.constant 0 : i32
    %c0_i32_0 = arith.constant 0 : i32
    return %arg0, %c0_i32 : i32, i32
  }
}

</mosaic_0001>

<bundles_post_ra>
// kernel: tpu_custom_call.1
= control target key start
LH: loop header
LB: loop body
LE: loop exit
PB: predicated region body
PF: predicated region fallthrough
CT: control target
= control target key end

     0   :  { %10 = vsyncpa [#allocation4], 0  ;;  %s1360_s0 = inlined_call_operand.hbm [shape: f32[2,1024], index: 0, kind: input, shape index: {}]   ;;  %s1361_s1 = inlined_call_operand.hbm [shape: bf16[1024,128], index: 1, kind: input, shape index: {}]   ;;  %s1362_s2 = inlined_call_operand.vmem [shape: f32[1,128], index: 2, kind: input, shape index: {}]   ;;  %s1363_s3 = inlined_call_operand.hbm [shape: bf16[128,128], index: 3, kind: input, shape index: {}]   ;;  %s1364_s4 = inlined_call_operand.vmem [shape: f32[1,128], index: 4, kind: input, shape index: {}]   ;;  %s1365_s5 = inlined_call_operand.hbm [shape: f32[2,128], index: 5, kind: output, shape index: {}]  }
   0x1   :  { %11 = vsyncpa [#allocation7], 0 }
   0x2   :  { %12 = vsyncpa [#allocation5], 0  ;;  %s1297_s18 = smov [#allocation6]  }
   0x3   :  { %s28_s19 = sshll.u32 %s1297_s18, 4  ;;  %s29_s19 = int_to_ptr.vmem [resolvable:$true] %s28_s19 }
   0x4   :  { %s1219_s20 = scalar_lea.vmem %s29_s19, 8192  ;;  %p1224_p1 = scmp.lt.s32.totalorder %s29_s19, %s29_s19 }
   0x5   :  { %p1220_p0 = scmp.ne.s32.totalorder %s29_s19, %s1219_s20  ;;  %p1225_p2 = scmp.lt.s32.totalorder %s1219_s20, %s1219_s20 }
   0x7   :  { %p1226_p3 = por %p1225_p2, %p1224_p1 }
   0x9   :  { %p1227_p4 = pnand %p1226_p3, %p1220_p0 }
   0xb   :  { %1230 = shalt.err (!%p1227_p4)
}
   0xc   :  { %s1298_s21 = smov 64   ;;  %s1299_s22 = smov 4  }
   0xd   :  { %34 = dma.hbm_to_vmem [thread:$0]  %s1361_s1, 8192, %s29_s19, [#allocation7], %s1298_s21, %s1298_s21, %s1299_s22  }
   0xe   :  { %s1300_s25 = smov [#allocation3]   ;;  %s1301_s27 = smov [#allocation8]  }
   0xf   :  { %s19_s26 = sshll.u32 %s1300_s25, 4  ;;  %s42_s28 = sshll.u32 %s1301_s27, 4  ;;  %s20_s26 = int_to_ptr.vmem [resolvable:$true] %s19_s26  ;;  %s43_s28 = int_to_ptr.vmem [resolvable:$true] %s42_s28 }
  0x10   :  { %s1239_s29 = scalar_lea.vmem %s20_s26, 256  ;;  %p1244_p6 = scmp.lt.s32.totalorder %s20_s26, %s20_s26 }
  0x11   :  { %p1240_p5 = scmp.ne.s32.totalorder %s20_s26, %s1239_s29  ;;  %p1245_p7 = scmp.lt.s32.totalorder %s1239_s29, %s1239_s29 }
  0x13   :  { %p1246_p8 = por %p1245_p7, %p1244_p6 }
  0x15   :  { %p1247_p9 = pnand %p1246_p8, %p1240_p5 }
  0x17   :  { %1250 = shalt.err (!%p1247_p9)
}
  0x18   :  { %22 = dma.hbm_to_vmem [thread:$0]  %s1360_s0, 256, %s20_s26, [#allocation4]  }
  0x19   :  { %s1259_s7 = scalar_lea.vmem %s43_s28, 1024  ;;  %p1264_p11 = scmp.lt.s32.totalorder %s43_s28, %s43_s28 }
  0x1a   :  { %p1260_p10 = scmp.ne.s32.totalorder %s43_s28, %s1259_s7  ;;  %p1265_p12 = scmp.lt.s32.totalorder %s1259_s7, %s1259_s7 }
  0x1c   :  { %p1266_p13 = por %p1265_p12, %p1264_p11 }
  0x1e   :  { %p1267_p0 = pnand %p1266_p13, %p1260_p10 }
  0x20   :  { %1270 = shalt.err (!%p1267_p0)
}
  0x21   :  { %48 = dma.hbm_to_vmem [thread:$0]  %s1363_s3, 1024, %s43_s28, [#allocation7], %s1298_s21, %s1298_s21, %s1299_s22  }
  0x22   :  { %1291 = dma.done.wait [#allocation4], 256  }
  0x23   :  { %1292 = vsyncadd [#allocation4], 4294967040 }
  0x24   :  { %1293 = dma.done.wait [#allocation7], 9216  }
  0x25   :  { %1294 = vsyncadd [#allocation7], 4294958080  ;;  %v1137_v0 = vld [vmem:[#allocation6 + $0x78] sm:$0xff]   ;;  %v1141_v4 = vld [vmem:[#allocation6 + $0x70] sm:$0xff]   ;;  %v1302_v22 = vmov 1983009808   ;;  %v75_v24 = vlaneseq }
  0x26   :  { %v1138_v1 = vld [vmem:[#allocation6 + $0xf8] sm:$0xff]   ;;  %1011 = vmatprep.subr.bf16.mxu0 %v1137_v0  ;;  %v1142_v5 = vld [vmem:[#allocation6 + $0xf0] sm:$0xff]   ;;  %v1145_v8 = vld [vmem:[#allocation6 + $0x68] sm:$0xff]   ;;  %v73_v23 = vunpack.c.l.s4 %v1302_v22  ;;  %vm1304_vm0 = vmmov 0   ;;  %s1305_s11 = smov [#allocation9]  }
  0x27   :  { %v1139_v2 = vld [vmem:[#allocation6 + $0x38] sm:$0xff]   ;;  %1033 = vmatprep.subr.bf16.mxu1 %v1138_v1  ;;  %v1143_v6 = vld [vmem:[#allocation6 + $0x30] sm:$0xff]   ;;  %v1146_v9 = vld [vmem:[#allocation6 + $0xe8] sm:$0xff]   ;;  %v76_v30 = vshrl.u32 %v75_v24, 7  ;;  %s927_s12 = sshll.u32 %s1305_s11, 4  ;;  %s928_s12 = int_to_ptr.vmem [resolvable:$true] %s927_s12 }
  0x28   :  { %v1140_v3 = vld [vmem:[#allocation6 + $0xb8] sm:$0xff]   ;;  %1012 = vmatpush3.bf16.msra.mxu0 %v1139_v2  ;;  %v1144_v7 = vld [vmem:[#allocation6 + $0xb0] sm:$0xff]   ;;  %v1147_v10 = vld [vmem:[#allocation6 + $0x28] sm:$0xff]   ;;  %v74_v29 = vunpack.c.0.s8 %v73_v23  ;;  %s1271_s13 = scalar_lea.vmem %s928_s12, 32  ;;  %p1276_p2 = scmp.lt.s32.totalorder %s928_s12, %s928_s12 }
  0x29   :  { %1034 = vmatpush3.bf16.msra.mxu1 %v1140_v3  ;;  %1013 = vmatprep.subr.bf16.mxu0 %v1141_v4  ;;  %v1148_v11 = vld [vmem:[#allocation6 + $0xa8] sm:$0xff]   ;;  %v1149_v12 = vld [vmem:[#allocation6 + $0x60] sm:$0xff]   ;;  %v1153_v16 = vld [vmem:[#allocation6 + $0x58] sm:$0xff]   ;;  %p1272_p1 = scmp.ne.s32.totalorder %s928_s12, %s1271_s13  ;;  %p1277_p3 = scmp.lt.s32.totalorder %s1271_s13, %s1271_s13 }
  0x2a   :  { %1035 = vmatprep.subr.bf16.mxu1 %v1142_v5  ;;  %v1150_v13 = vld [vmem:[#allocation6 + $0xe0] sm:$0xff]   ;;  %v1154_v17 = vld [vmem:[#allocation6 + $0xd8] sm:$0xff]   ;;  %v1157_v20 = vld [vmem:[#allocation6 + $0x50] sm:$0xff]   ;;  %v1345_v35 = vsub.s32 %v74_v29, %v76_v30 }
  0x2b   :  { %v1151_v14 = vld [vmem:[#allocation6 + $0x20] sm:$0xff]   ;;  %v1155_v18 = vld [vmem:[#allocation6 + $0x18] sm:$0xff]   ;;  %v1158_v21 = vld [vmem:[#allocation6 + $0xd0] sm:$0xff]   ;;  %p1278_p4 = por %p1277_p3, %p1276_p2 }
  0x2c   :  { %1014 = vmatpush3.bf16.msra.mxu0 %v1143_v6  ;;  %v1152_v15 = vld [vmem:[#allocation6 + $0xa0] sm:$0xff]   ;;  %v1156_v19 = vld [vmem:[#allocation6 + $0x98] sm:$0xff]   ;;  %v1159_v25 = vld [vmem:[#allocation6 + $0x10] sm:$0xff]  }
  0x2d   :  { %1036 = vmatpush3.bf16.msra.mxu1 %v1144_v7  ;;  %1015 = vmatprep.subr.bf16.mxu0 %v1145_v8  ;;  %v1160_v26 = vld [vmem:[#allocation6 + $0x90] sm:$0xff]   ;;  %v1161_v27 = vld [vmem:[#allocation6 + $0x48] sm:$0xff]   ;;  %v1165_v33 = vld [vmem:[#allocation6 + $0x40] sm:$0xff]   ;;  %p1279_p5 = pnand %p1278_p4, %p1272_p1 }
  0x2e   :  { %1037 = vmatprep.subr.bf16.mxu1 %v1146_v9  ;;  %v1162_v28 = vld [vmem:[#allocation6 + $0xc8] sm:$0xff]   ;;  %v1166_v34 = vld [vmem:[#allocation6 + $0xc0] sm:$0xff]   ;;  %v67_v38 = vld [vmem:[#allocation3] sm:$0xff] }
  0x2f   :  { %v1163_v31 = vld [vmem:[#allocation6 + $0x8] sm:$0xff]   ;;  %v1167_v36 = vld [vmem:[#allocation6] sm:$0xff]   ;;  %v78_v39 = vrot.slane %v67_v38, %v1345_v35  ;;  %v71_v40 = vcombine.high %v67_v38, %v67_v38  ;;  %v1170_v41 = vld [vmem:[#allocation6 + $0x178] sm:$0xff]  }
  0x30   :  { %1016 = vmatpush3.bf16.msra.mxu0 %v1147_v10  ;;  %v1164_v32 = vld [vmem:[#allocation6 + $0x88] sm:$0xff]   ;;  %v1168_v37 = vld [vmem:[#allocation6 + $0x80] sm:$0xff]   ;;  %v1171_v42 = vld [vmem:[#allocation6 + $0x1f8] sm:$0xff]  }
  0x31   :  { %1038 = vmatpush3.bf16.msra.mxu1 %v1148_v11  ;;  %1017 = vmatprep.subr.bf16.mxu0 %v1149_v12  ;;  %v86_v43 = vcombine.high %v78_v39, %v78_v39  ;;  %v85_v44 = vrot.slane %v71_v40, %v1345_v35  ;;  %v113_v45 = vpack.c.bf16 %v78_v39, %v78_v39  ;;  %v1172_v46 = vld [vmem:[#allocation6 + $0x138] sm:$0xff]   ;;  %v1174_v51 = vld [vmem:[#allocation6 + $0x170] sm:$0xff]   ;;  %v1178_v56 = vld [vmem:[#allocation6 + $0x168] sm:$0xff]  }
  0x32   :  { %1039 = vmatprep.subr.bf16.mxu1 %v1150_v13  ;;  %v1173_v49 = vld [vmem:[#allocation6 + $0x1b8] sm:$0xff]   ;;  %v1175_v53 = vld [vmem:[#allocation6 + $0x1f0] sm:$0xff]   ;;  %v1179_v57 = vld [vmem:[#allocation6 + $0x1e8] sm:$0xff]  }
  0x33   :  { %v114_v47 = vpack.c.bf16 %v86_v43, %v86_v43  ;;  %v87_v48 = vcombine.high %v85_v44, %v85_v44  ;;  %v115_v50 = vpack.c.bf16 %v85_v44, %v85_v44  ;;  %v1176_v54 = vld [vmem:[#allocation6 + $0x130] sm:$0xff]   ;;  %v1180_v58 = vld [vmem:[#allocation6 + $0x128] sm:$0xff]   ;;  %v1182_v60 = vld [vmem:[#allocation6 + $0x160] sm:$0xff]  }
  0x34   :  { %1018 = vmatpush3.bf16.msra.mxu0 %v1151_v14  ;;  %v1177_v55 = vld [vmem:[#allocation6 + $0x1b0] sm:$0xff]   ;;  %v1181_v59 = vld [vmem:[#allocation6 + $0x1a8] sm:$0xff]   ;;  %v1183_v61 = vld [vmem:[#allocation6 + $0x1e0] sm:$0xff]  }
  0x35   :  { %1040 = vmatpush3.bf16.msra.mxu1 %v1152_v15  ;;  %1019 = vmatprep.subr.bf16.mxu0 %v1153_v16  ;;  %v116_v52 = vpack.c.bf16 %v87_v48, %v87_v48  ;;  %v1184_v62 = vld [vmem:[#allocation6 + $0x120] sm:$0xff]   ;;  %v1186_v0 = vld [vmem:[#allocation6 + $0x158] sm:$0xff]   ;;  %v1190_v4 = vld [vmem:[#allocation6 + $0x150] sm:$0xff]  }
  0x36   :  { %1041 = vmatprep.subr.bf16.mxu1 %v1154_v17  ;;  %665 = vmatprep.mubr.bf16.mxu0 %v114_v47  ;;  %v1185_v63 = vld [vmem:[#allocation6 + $0x1a0] sm:$0xff]   ;;  %v1187_v1 = vld [vmem:[#allocation6 + $0x1d8] sm:$0xff]   ;;  %v1191_v5 = vld [vmem:[#allocation6 + $0x1d0] sm:$0xff]  }
  0x37   :  { %705 = vmatprep.mubr.bf16.mxu1 %v116_v52  ;;  %v1188_v2 = vld [vmem:[#allocation6 + $0x118] sm:$0xff]   ;;  %v1192_v6 = vld [vmem:[#allocation6 + $0x110] sm:$0xff]   ;;  %v1194_v8 = vld [vmem:[#allocation6 + $0x148] sm:$0xff]  }
  0x38   :  { %1020 = vmatpush3.bf16.msra.mxu0 %v1155_v18  ;;  %v1189_v3 = vld [vmem:[#allocation6 + $0x198] sm:$0xff]   ;;  %v1193_v7 = vld [vmem:[#allocation6 + $0x190] sm:$0xff]   ;;  %v1195_v9 = vld [vmem:[#allocation6 + $0x1c8] sm:$0xff]  }
  0x39   :  { %1042 = vmatpush3.bf16.msra.mxu1 %v1156_v19  ;;  %1021 = vmatprep.subr.bf16.mxu0 %v1157_v20  ;;  %v1196_v10 = vld [vmem:[#allocation6 + $0x108] sm:$0xff]   ;;  %v1198_v12 = vld [vmem:[#allocation6 + $0x140] sm:$0xff]   ;;  %v68_v15 = vld [vmem:[#allocation3 + $0x8] sm:$0xff] }
  0x3a   :  { %1043 = vmatprep.subr.bf16.mxu1 %v1158_v21  ;;  %v1197_v11 = vld [vmem:[#allocation6 + $0x188] sm:$0xff]   ;;  %v1199_v13 = vld [vmem:[#allocation6 + $0x1c0] sm:$0xff]   ;;  %v95_v17 = vrot.slane %v68_v15, %v1345_v35  ;;  %v88_v18 = vcombine.high %v68_v15, %v68_v15 }
  0x3b   :  { %v1200_v14 = vld [vmem:[#allocation6 + $0x100] sm:$0xff]   ;;  %v1205_v29 = vld [vmem:[#allocation8 + $0x28] sm:$0xff]  }
  0x3c   :  { %1022 = vmatpush3.bf16.msra.mxu0 %v1159_v25  ;;  %v1201_v16 = vld [vmem:[#allocation6 + $0x180] sm:$0xff]   ;;  %v103_v19 = vcombine.high %v95_v17, %v95_v17  ;;  %v102_v20 = vrot.slane %v88_v18, %v1345_v35  ;;  %v117_v21 = vpack.c.bf16 %v95_v17, %v95_v17 }
  0x3d   :  { %1044 = vmatpush3.bf16.msra.mxu1 %v1160_v26  ;;  %1023 = vmatprep.subr.bf16.mxu0 %v1161_v27  ;;  %v1203_v26 = vld [vmem:[#allocation8 + $0x38] sm:$0xff]   ;;  %v1303_v27 = vmov 0.0   ;;  %v1206_v30 = vld [vmem:[#allocation8 + $0x20] sm:$0xff]  }
  0x3e   :  { %1045 = vmatprep.subr.bf16.mxu1 %v1162_v28  ;;  %v118_v22 = vpack.c.bf16 %v103_v19, %v103_v19  ;;  %v104_v23 = vcombine.high %v102_v20, %v102_v20  ;;  %v119_v24 = vpack.c.bf16 %v102_v20, %v102_v20  ;;  %65 = vst [vmem:[#allocation2] sm:$0x3] %v1303_v27  ;;  %v1204_v28 = vld [vmem:[#allocation8 + $0x30] sm:$0xff]  }
  0x40   :  { %1024 = vmatpush3.bf16.msra.mxu0 %v1163_v31  ;;  %v120_v25 = vpack.c.bf16 %v104_v23, %v104_v23  ;;  %v1207_v31 = vld [vmem:[#allocation8 + $0x18] sm:$0xff]  }
  0x41   :  { %1046 = vmatpush3.bf16.msra.mxu1 %v1164_v32  ;;  %1025 = vmatprep.subr.bf16.mxu0 %v1165_v33  ;;  %v1208_v32 = vld [vmem:[#allocation8 + $0x10] sm:$0xff]   ;;  %v1209_v33 = vld [vmem:[#allocation8 + $0x8] sm:$0xff]  }
  0x42   :  { %1047 = vmatprep.subr.bf16.mxu1 %v1166_v34  ;;  %v1210_v34 = vld [vmem:[#allocation8] sm:$0xff]  }
  0x44   :  { %1026 = vmatpush3.bf16.msra.mxu0 %v1167_v36 }
  0x45   :  { %1048 = vmatpush3.bf16.msra.mxu1 %v1168_v37  ;;  %1055 = vmatprep.subr.bf16.mxu0 %v1170_v41 }
  0x46   :  { %1077 = vmatprep.subr.bf16.mxu1 %v1171_v42 }
  0x47   :  { %666 = vmatmul.mubr.bf16.vlgmr.msra.gmra.mxu0 %v113_v45 }
  0x48   :  { %1056 = vmatpush3.bf16.msra.mxu0 %v1172_v46  ;;  %706 = vmatmul.mubr.bf16.vlgmr.msra.gmra.mxu1 %v115_v50 }
  0x49   :  { %1057 = vmatprep.subr.bf16.mxu0 %v1174_v51  ;;  %1078 = vmatpush3.bf16.msra.mxu1 %v1173_v49 }
  0x4a   :  { %1079 = vmatprep.subr.bf16.mxu1 %v1175_v53  ;;  %745 = vmatprep.mubr.bf16.mxu0 %v118_v22 }
  0x4b   :  { %785 = vmatprep.mubr.bf16.mxu1 %v120_v25 }
  0x4c   :  { %1058 = vmatpush3.bf16.msra.mxu0 %v1176_v54  ;;  %v66_v54 = vld [vmem:[#allocation2] sm:$0x3] }
  0x4d   :  { %1059 = vmatprep.subr.bf16.mxu0 %v1178_v56  ;;  %1080 = vmatpush3.bf16.msra.mxu1 %v1177_v55 }
  0x4e   :  { %1081 = vmatprep.subr.bf16.mxu1 %v1179_v57 }
  0x50   :  { %1060 = vmatpush3.bf16.msra.mxu0 %v1180_v58 }
  0x51   :  { %1061 = vmatprep.subr.bf16.mxu0 %v1182_v60  ;;  %1082 = vmatpush3.bf16.msra.mxu1 %v1181_v59  ;;  %v1001_v60 = vld [vmem:[%s1362_s2] ss:$0 sm:$0xff] }
  0x52   :  { %1083 = vmatprep.subr.bf16.mxu1 %v1183_v61 }
  0x54   :  { %1062 = vmatpush3.bf16.msra.mxu0 %v1184_v62 }
  0x55   :  { %1063 = vmatprep.subr.bf16.mxu0 %v1186_v0  ;;  %1084 = vmatpush3.bf16.msra.mxu1 %v1185_v63 }
  0x56   :  { %1085 = vmatprep.subr.bf16.mxu1 %v1187_v1  ;;  %v1002_v1 = vld [vmem:[%s1364_s4] ss:$0 sm:$0xff] }
  0x58   :  { %1064 = vmatpush3.bf16.msra.mxu0 %v1188_v2 }
  0x59   :  { %1065 = vmatprep.subr.bf16.mxu0 %v1190_v4  ;;  %1086 = vmatpush3.bf16.msra.mxu1 %v1189_v3 }
  0x5a   :  { %1087 = vmatprep.subr.bf16.mxu1 %v1191_v5 }
  0x5c   :  { %1066 = vmatpush3.bf16.msra.mxu0 %v1192_v6 }
  0x5d   :  { %1067 = vmatprep.subr.bf16.mxu0 %v1194_v8  ;;  %1088 = vmatpush3.bf16.msra.mxu1 %v1193_v7 }
  0x5e   :  { %1089 = vmatprep.subr.bf16.mxu1 %v1195_v9 }
  0x60   :  { %1068 = vmatpush3.bf16.msra.mxu0 %v1196_v10 }
  0x61   :  { %1069 = vmatprep.subr.bf16.mxu0 %v1198_v12  ;;  %1090 = vmatpush3.bf16.msra.mxu1 %v1197_v11 }
  0x62   :  { %1091 = vmatprep.subr.bf16.mxu1 %v1199_v13 }
  0x64   :  { %1070 = vmatpush3.bf16.msra.mxu0 %v1200_v14 }
  0x65   :  { %1092 = vmatpush3.bf16.msra.mxu1 %v1201_v16  ;;  %1108 = vmatprep.subr.bf16.mxu0 %v1303_v27 }
  0x67   :  { %746 = vmatmul.mubr.bf16.vlgmr.msra.gmra.mxu0 %v117_v21 }
  0x68   :  { %786 = vmatmul.mubr.bf16.vlgmr.msra.gmra.mxu1 %v119_v24  ;;  %1109 = vmatpush3.bf16.msra.mxu0 %v1203_v26 }
  0x69   :  { %1110 = vmatprep.subr.bf16.mxu0 %v1303_v27  ;;  %1124 = vmatprep.mubr.msk.bf16.mxu0 %vm1304_vm0, %v1303_v27 }
  0x6c   :  { %1111 = vmatpush3.bf16.msra.mxu0 %v1204_v28 }
  0x6d   :  { %1112 = vmatprep.subr.bf16.mxu0 %v1303_v27 }
  0x70   :  { %1113 = vmatpush3.bf16.msra.mxu0 %v1205_v29 }
  0x71   :  { %1114 = vmatprep.subr.bf16.mxu0 %v1303_v27 }
  0x74   :  { %1115 = vmatpush3.bf16.msra.mxu0 %v1206_v30 }
  0x75   :  { %1116 = vmatprep.subr.bf16.mxu0 %v1303_v27 }
  0x78   :  { %1117 = vmatpush3.bf16.msra.mxu0 %v1207_v31 }
  0x79   :  { %1118 = vmatprep.subr.bf16.mxu0 %v1303_v27 }
  0x7c   :  { %1119 = vmatpush3.bf16.msra.mxu0 %v1208_v32 }
  0x7d   :  { %1120 = vmatprep.subr.bf16.mxu0 %v1303_v27 }
  0x80   :  { %1121 = vmatpush3.bf16.msra.mxu0 %v1209_v33 }
  0x81   :  { %1122 = vmatprep.subr.bf16.mxu0 %v1303_v27 }
  0x84   :  { %1123 = vmatpush3.bf16.msra.mxu0 %v1210_v34 }
 0x107   :  { %v1027_v35 = vpop.f32.mrf.mxu0 }
 0x108   :  { %v1049_v36 = vpop.f32.mrf.mxu1 }
 0x109   :  { %v1028_v37 = vpop.f32.mrf.mxu0 }
 0x10a   :  { %v1050_v38 = vpop.f32.mrf.mxu1  ;;  %v1029_v43 = vadd.f32 %v1028_v37, %v1027_v35 }
 0x10b   :  { %v1030_v39 = vpop.f32.mrf.mxu0  ;;  %v1051_v44 = vadd.f32 %v1050_v38, %v1049_v36 }
 0x10c   :  { %v1052_v40 = vpop.f32.mrf.mxu1 }
 0x10d   :  { %v1031_v41 = vpop.f32.mrf.mxu0  ;;  %v708_v48 = vadd.f32 %v1051_v44, %v1029_v43 }
 0x10e   :  { %v1053_v42 = vpop.f32.mrf.mxu1 }
 0x127   :  { %v1071_v45 = vpop.f32.mrf.mxu0 }
 0x128   :  { %v1093_v46 = vpop.f32.mrf.mxu1 }
 0x129   :  { %v1072_v47 = vpop.f32.mrf.mxu0 }
 0x12a   :  { %v1073_v49 = vadd.f32 %v1072_v47, %v1071_v45  ;;  %v1094_v50 = vpop.f32.mrf.mxu1 }
 0x12b   :  { %v1074_v51 = vpop.f32.mrf.mxu0  ;;  %v1095_v53 = vadd.f32 %v1094_v50, %v1093_v46 }
 0x12c   :  { %v748_v52 = vadd.f32 %v1073_v49, %v708_v48  ;;  %v1096_v55 = vpop.f32.mrf.mxu1 }
 0x12d   :  { %v1075_v56 = vpop.f32.mrf.mxu0 }
 0x12e   :  { %v788_v57 = vadd.f32 %v1095_v53, %v748_v52  ;;  %v1097_v58 = vpop.f32.mrf.mxu1 }
 0x130   :  { %v793_v59 = vadd.f32 %v788_v57, %v66_v54 }
 0x132   :  { %794 = vst [vmem:[#allocation2] sm:$0x3] %v793_v59 }
 0x139   :  { %v798_v61 = vld [vmem:[#allocation2] sm:$0x3] }
 0x13a   :  { %v806_v62 = vadd.f32 %v1001_v60, %v798_v61 }
 0x13c   :  { %v807_v63 = vmax.f32 %v806_v62, 0.0 }
 0x13e   :  { %v808_v0 = vpack.c.bf16 %v807_v63, %v807_v63 }
 0x140   :  { %1125 = vmatmul.mubr.bf16.vlgmr.msra.gmra.mxu0 %v808_v0 }
 0x200   :  { %v914_v2 = vpop.f32.mrf.mxu0 }
 0x201   :  { %v915_v3 = vadd.f32 %v1002_v1, %v914_v2 }
 0x202   :  { %v1126_v4 = vpop.f32.mrf.mxu0 }
 0x203   :  { %920 = vst [vmem:[#allocation9] sm:$0x3] %v915_v3 }
 0x204   :  { %v917_v5 = vpop.f32.mrf.mxu0 }
 0x205   :  { %1282 = shalt.err (!%p1279_p5)
}
 0x206   :  { %930 = dma.vmem_to_hbm [thread:$0]  %s928_s12, 32, %s1365_s5, [#allocation5]   ;;  %v1127_v6 = vpop.f32.mrf.mxu0 }
 0x207   :  { %1295 = dma.done.wait [#allocation5], 32  }
 0x208   :  { %1296 = vsyncadd [#allocation5], 4294967264 }
 0x209   :  { %934 = vsyncpa [#allocation4], 1 }
 0x20a   :  { %935 = vsyncpa [#allocation7], 1 }
 0x20b   :  { %936 = vsyncpa [#allocation5], 1 }

// kernel: tpu_custom_call.1
= control target key start
LH: loop header
LB: loop body
LE: loop exit
PB: predicated region body
PF: predicated region fallthrough
CT: control target
= control target key end

     0   :  { %10 = vsyncpa [#allocation4], 0  ;;  %s1360_s0 = inlined_call_operand.hbm [shape: f32[2,1024], index: 0, kind: input, shape index: {}]   ;;  %s1361_s1 = inlined_call_operand.hbm [shape: bf16[1024,128], index: 1, kind: input, shape index: {}]   ;;  %s1362_s2 = inlined_call_operand.vmem [shape: f32[1,128], index: 2, kind: input, shape index: {}]   ;;  %s1363_s3 = inlined_call_operand.hbm [shape: bf16[128,128], index: 3, kind: input, shape index: {}]   ;;  %s1364_s4 = inlined_call_operand.vmem [shape: f32[1,128], index: 4, kind: input, shape index: {}]   ;;  %s1365_s5 = inlined_call_operand.hbm [shape: f32[2,128], index: 5, kind: output, shape index: {}]  }
   0x1   :  { %11 = vsyncpa [#allocation7], 0 }
   0x2   :  { %12 = vsyncpa [#allocation5], 0  ;;  %s1297_s18 = smov [#allocation6]  }
   0x3   :  { %s28_s19 = sshll.u32 %s1297_s18, 4  ;;  %s29_s19 = int_to_ptr.vmem [resolvable:$true] %s28_s19 }
   0x4   :  { %s1219_s20 = scalar_lea.vmem %s29_s19, 8192  ;;  %p1224_p1 = scmp.lt.s32.totalorder %s29_s19, %s29_s19 }
   0x5   :  { %p1220_p0 = scmp.ne.s32.totalorder %s29_s19, %s1219_s20  ;;  %p1225_p2 = scmp.lt.s32.totalorder %s1219_s20, %s1219_s20 }
   0x7   :  { %p1226_p3 = por %p1225_p2, %p1224_p1 }
   0x9   :  { %p1227_p4 = pnand %p1226_p3, %p1220_p0 }
   0xb   :  { %1230 = shalt.err (!%p1227_p4)
}
   0xc   :  { %s1298_s21 = smov 64   ;;  %s1299_s22 = smov 4  }
   0xd   :  { %34 = dma.hbm_to_vmem [thread:$0]  %s1361_s1, 8192, %s29_s19, [#allocation7], %s1298_s21, %s1298_s21, %s1299_s22  }
   0xe   :  { %s1300_s25 = smov [#allocation3]   ;;  %s1301_s27 = smov [#allocation8]  }
   0xf   :  { %s19_s26 = sshll.u32 %s1300_s25, 4  ;;  %s42_s28 = sshll.u32 %s1301_s27, 4  ;;  %s20_s26 = int_to_ptr.vmem [resolvable:$true] %s19_s26  ;;  %s43_s28 = int_to_ptr.vmem [resolvable:$true] %s42_s28 }
  0x10   :  { %s1239_s29 = scalar_lea.vmem %s20_s26, 256  ;;  %p1244_p6 = scmp.lt.s32.totalorder %s20_s26, %s20_s26 }
  0x11   :  { %p1240_p5 = scmp.ne.s32.totalorder %s20_s26, %s1239_s29  ;;  %p1245_p7 = scmp.lt.s32.totalorder %s1239_s29, %s1239_s29 }
  0x13   :  { %p1246_p8 = por %p1245_p7, %p1244_p6 }
  0x15   :  { %p1247_p9 = pnand %p1246_p8, %p1240_p5 }
  0x17   :  { %1250 = shalt.err (!%p1247_p9)
}
  0x18   :  { %22 = dma.hbm_to_vmem [thread:$0]  %s1360_s0, 256, %s20_s26, [#allocation4]  }
  0x19   :  { %s1259_s7 = scalar_lea.vmem %s43_s28, 1024  ;;  %p1264_p11 = scmp.lt.s32.totalorder %s43_s28, %s43_s28 }
  0x1a   :  { %p1260_p10 = scmp.ne.s32.totalorder %s43_s28, %s1259_s7  ;;  %p1265_p12 = scmp.lt.s32.totalorder %s1259_s7, %s1259_s7 }
  0x1c   :  { %p1266_p13 = por %p1265_p12, %p1264_p11 }
  0x1e   :  { %p1267_p0 = pnand %p1266_p13, %p1260_p10 }
  0x20   :  { %1270 = shalt.err (!%p1267_p0)
}
  0x21   :  { %48 = dma.hbm_to_vmem [thread:$0]  %s1363_s3, 1024, %s43_s28, [#allocation7], %s1298_s21, %s1298_s21, %s1299_s22  }
  0x22   :  { %1291 = dma.done.wait [#allocation4], 256  }
  0x23   :  { %1292 = vsyncadd [#allocation4], 4294967040 }
  0x24   :  { %1293 = dma.done.wait [#allocation7], 9216  }
  0x25   :  { %1294 = vsyncadd [#allocation7], 4294958080  ;;  %v1137_v0 = vld [vmem:[#allocation6 + $0x78] sm:$0xff]   ;;  %v1141_v4 = vld [vmem:[#allocation6 + $0x70] sm:$0xff]   ;;  %v1302_v22 = vmov 1983009808   ;;  %v75_v24 = vlaneseq }
  0x26   :  { %v1138_v1 = vld [vmem:[#allocation6 + $0xf8] sm:$0xff]   ;;  %1011 = vmatprep.subr.bf16.mxu0 %v1137_v0  ;;  %v1142_v5 = vld [vmem:[#allocation6 + $0xf0] sm:$0xff]   ;;  %v1145_v8 = vld [vmem:[#allocation6 + $0x68] sm:$0xff]   ;;  %v73_v23 = vunpack.c.l.s4 %v1302_v22  ;;  %vm1304_vm0 = vmmov 0   ;;  %s1305_s11 = smov [#allocation9]  }
  0x27   :  { %v1139_v2 = vld [vmem:[#allocation6 + $0x38] sm:$0xff]   ;;  %1033 = vmatprep.subr.bf16.mxu1 %v1138_v1  ;;  %v1143_v6 = vld [vmem:[#allocation6 + $0x30] sm:$0xff]   ;;  %v1146_v9 = vld [vmem:[#allocation6 + $0xe8] sm:$0xff]   ;;  %v76_v30 = vshrl.u32 %v75_v24, 7  ;;  %s927_s12 = sshll.u32 %s1305_s11, 4  ;;  %s928_s12 = int_to_ptr.vmem [resolvable:$true] %s927_s12 }
  0x28   :  { %v1140_v3 = vld [vmem:[#allocation6 + $0xb8] sm:$0xff]   ;;  %1012 = vmatpush3.bf16.msra.mxu0 %v1139_v2  ;;  %v1144_v7 = vld [vmem:[#allocation6 + $0xb0] sm:$0xff]   ;;  %v1147_v10 = vld [vmem:[#allocation6 + $0x28] sm:$0xff]   ;;  %v74_v29 = vunpack.c.0.s8 %v73_v23  ;;  %s1271_s13 = scalar_lea.vmem %s928_s12, 32  ;;  %p1276_p2 = scmp.lt.s32.totalorder %s928_s12, %s928_s12 }
  0x29   :  { %1034 = vmatpush3.bf16.msra.mxu1 %v1140_v3  ;;  %1013 = vmatprep.subr.bf16.mxu0 %v1141_v4  ;;  %v1148_v11 = vld [vmem:[#allocation6 + $0xa8] sm:$0xff]   ;;  %v1149_v12 = vld [vmem:[#allocation6 + $0x60] sm:$0xff]   ;;  %v1153_v16 = vld [vmem:[#allocation6 + $0x58] sm:$0xff]   ;;  %p1272_p1 = scmp.ne.s32.totalorder %s928_s12, %s1271_s13  ;;  %p1277_p3 = scmp.lt.s32.totalorder %s1271_s13, %s1271_s13 }
  0x2a   :  { %1035 = vmatprep.subr.bf16.mxu1 %v1142_v5  ;;  %v1150_v13 = vld [vmem:[#allocation6 + $0xe0] sm:$0xff]   ;;  %v1154_v17 = vld [vmem:[#allocation6 + $0xd8] sm:$0xff]   ;;  %v1157_v20 = vld [vmem:[#allocation6 + $0x50] sm:$0xff]   ;;  %v1345_v35 = vsub.s32 %v74_v29, %v76_v30 }
  0x2b   :  { %v1151_v14 = vld [vmem:[#allocation6 + $0x20] sm:$0xff]   ;;  %v1155_v18 = vld [vmem:[#allocation6 + $0x18] sm:$0xff]   ;;  %v1158_v21 = vld [vmem:[#allocation6 + $0xd0] sm:$0xff]   ;;  %p1278_p4 = por %p1277_p3, %p1276_p2 }
  0x2c   :  { %1014 = vmatpush3.bf16.msra.mxu0 %v1143_v6  ;;  %v1152_v15 = vld [vmem:[#allocation6 + $0xa0] sm:$0xff]   ;;  %v1156_v19 = vld [vmem:[#allocation6 + $0x98] sm:$0xff]   ;;  %v1159_v25 = vld [vmem:[#allocation6 + $0x10] sm:$0xff]  }
  0x2d   :  { %1036 = vmatpush3.bf16.msra.mxu1 %v1144_v7  ;;  %1015 = vmatprep.subr.bf16.mxu0 %v1145_v8  ;;  %v1160_v26 = vld [vmem:[#allocation6 + $0x90] sm:$0xff]   ;;  %v1161_v27 = vld [vmem:[#allocation6 + $0x48] sm:$0xff]   ;;  %v1165_v33 = vld [vmem:[#allocation6 + $0x40] sm:$0xff]   ;;  %p1279_p5 = pnand %p1278_p4, %p1272_p1 }
  0x2e   :  { %1037 = vmatprep.subr.bf16.mxu1 %v1146_v9  ;;  %v1162_v28 = vld [vmem:[#allocation6 + $0xc8] sm:$0xff]   ;;  %v1166_v34 = vld [vmem:[#allocation6 + $0xc0] sm:$0xff]   ;;  %v67_v38 = vld [vmem:[#allocation3] sm:$0xff] }
  0x2f   :  { %v1163_v31 = vld [vmem:[#allocation6 + $0x8] sm:$0xff]   ;;  %v1167_v36 = vld [vmem:[#allocation6] sm:$0xff]   ;;  %v78_v39 = vrot.slane %v67_v38, %v1345_v35  ;;  %v71_v40 = vcombine.high %v67_v38, %v67_v38  ;;  %v1170_v41 = vld [vmem:[#allocation6 + $0x178] sm:$0xff]  }
  0x30   :  { %1016 = vmatpush3.bf16.msra.mxu0 %v1147_v10  ;;  %v1164_v32 = vld [vmem:[#allocation6 + $0x88] sm:$0xff]   ;;  %v1168_v37 = vld [vmem:[#allocation6 + $0x80] sm:$0xff]   ;;  %v1171_v42 = vld [vmem:[#allocation6 + $0x1f8] sm:$0xff]  }
  0x31   :  { %1038 = vmatpush3.bf16.msra.mxu1 %v1148_v11  ;;  %1017 = vmatprep.subr.bf16.mxu0 %v1149_v12  ;;  %v86_v43 = vcombine.high %v78_v39, %v78_v39  ;;  %v85_v44 = vrot.slane %v71_v40, %v1345_v35  ;;  %v113_v45 = vpack.c.bf16 %v78_v39, %v78_v39  ;;  %v1172_v46 = vld [vmem:[#allocation6 + $0x138] sm:$0xff]   ;;  %v1174_v51 = vld [vmem:[#allocation6 + $0x170] sm:$0xff]   ;;  %v1178_v56 = vld [vmem:[#allocation6 + $0x168] sm:$0xff]  }
  0x32   :  { %1039 = vmatprep.subr.bf16.mxu1 %v1150_v13  ;;  %v1173_v49 = vld [vmem:[#allocation6 + $0x1b8] sm:$0xff]   ;;  %v1175_v53 = vld [vmem:[#allocation6 + $0x1f0] sm:$0xff]   ;;  %v1179_v57 = vld [vmem:[#allocation6 + $0x1e8] sm:$0xff]  }
  0x33   :  { %v114_v47 = vpack.c.bf16 %v86_v43, %v86_v43  ;;  %v87_v48 = vcombine.high %v85_v44, %v85_v44  ;;  %v115_v50 = vpack.c.bf16 %v85_v44, %v85_v44  ;;  %v1176_v54 = vld [vmem:[#allocation6 + $0x130] sm:$0xff]   ;;  %v1180_v58 = vld [vmem:[#allocation6 + $0x128] sm:$0xff]   ;;  %v1182_v60 = vld [vmem:[#allocation6 + $0x160] sm:$0xff]  }
  0x34   :  { %1018 = vmatpush3.bf16.msra.mxu0 %v1151_v14  ;;  %v1177_v55 = vld [vmem:[#allocation6 + $0x1b0] sm:$0xff]   ;;  %v1181_v59 = vld [vmem:[#allocation6 + $0x1a8] sm:$0xff]   ;;  %v1183_v61 = vld [vmem:[#allocation6 + $0x1e0] sm:$0xff]  }
  0x35   :  { %1040 = vmatpush3.bf16.msra.mxu1 %v1152_v15  ;;  %1019 = vmatprep.subr.bf16.mxu0 %v1153_v16  ;;  %v116_v52 = vpack.c.bf16 %v87_v48, %v87_v48  ;;  %v1184_v62 = vld [vmem:[#allocation6 + $0x120] sm:$0xff]   ;;  %v1186_v0 = vld [vmem:[#allocation6 + $0x158] sm:$0xff]   ;;  %v1190_v4 = vld [vmem:[#allocation6 + $0x150] sm:$0xff]  }
  0x36   :  { %1041 = vmatprep.subr.bf16.mxu1 %v1154_v17  ;;  %665 = vmatprep.mubr.bf16.mxu0 %v114_v47  ;;  %v1185_v63 = vld [vmem:[#allocation6 + $0x1a0] sm:$0xff]   ;;  %v1187_v1 = vld [vmem:[#allocation6 + $0x1d8] sm:$0xff]   ;;  %v1191_v5 = vld [vmem:[#allocation6 + $0x1d0] sm:$0xff]  }
  0x37   :  { %705 = vmatprep.mubr.bf16.mxu1 %v116_v52  ;;  %v1188_v2 = vld [vmem:[#allocation6 + $0x118] sm:$0xff]   ;;  %v1192_v6 = vld [vmem:[#allocation6 + $0x110] sm:$0xff]   ;;  %v1194_v8 = vld [vmem:[#allocation6 + $0x148] sm:$0xff]  }
  0x38   :  { %1020 = vmatpush3.bf16.msra.mxu0 %v1155_v18  ;;  %v1189_v3 = vld [vmem:[#allocation6 + $0x198] sm:$0xff]   ;;  %v1193_v7 = vld [vmem:[#allocation6 + $0x190] sm:$0xff]   ;;  %v1195_v9 = vld [vmem:[#allocation6 + $0x1c8] sm:$0xff]  }
  0x39   :  { %1042 = vmatpush3.bf16.msra.mxu1 %v1156_v19  ;;  %1021 = vmatprep.subr.bf16.mxu0 %v1157_v20  ;;  %v1196_v10 = vld [vmem:[#allocation6 + $0x108] sm:$0xff]   ;;  %v1198_v12 = vld [vmem:[#allocation6 + $0x140] sm:$0xff]   ;;  %v68_v15 = vld [vmem:[#allocation3 + $0x8] sm:$0xff] }
  0x3a   :  { %1043 = vmatprep.subr.bf16.mxu1 %v1158_v21  ;;  %v1197_v11 = vld [vmem:[#allocation6 + $0x188] sm:$0xff]   ;;  %v1199_v13 = vld [vmem:[#allocation6 + $0x1c0] sm:$0xff]   ;;  %v95_v17 = vrot.slane %v68_v15, %v1345_v35  ;;  %v88_v18 = vcombine.high %v68_v15, %v68_v15 }
  0x3b   :  { %v1200_v14 = vld [vmem:[#allocation6 + $0x100] sm:$0xff]   ;;  %v1205_v29 = vld [vmem:[#allocation8 + $0x28] sm:$0xff]  }
  0x3c   :  { %1022 = vmatpush3.bf16.msra.mxu0 %v1159_v25  ;;  %v1201_v16 = vld [vmem:[#allocation6 + $0x180] sm:$0xff]   ;;  %v103_v19 = vcombine.high %v95_v17, %v95_v17  ;;  %v102_v20 = vrot.slane %v88_v18, %v1345_v35  ;;  %v117_v21 = vpack.c.bf16 %v95_v17, %v95_v17 }
  0x3d   :  { %1044 = vmatpush3.bf16.msra.mxu1 %v1160_v26  ;;  %1023 = vmatprep.subr.bf16.mxu0 %v1161_v27  ;;  %v1203_v26 = vld [vmem:[#allocation8 + $0x38] sm:$0xff]   ;;  %v1303_v27 = vmov 0.0   ;;  %v1206_v30 = vld [vmem:[#allocation8 + $0x20] sm:$0xff]  }
  0x3e   :  { %1045 = vmatprep.subr.bf16.mxu1 %v1162_v28  ;;  %v118_v22 = vpack.c.bf16 %v103_v19, %v103_v19  ;;  %v104_v23 = vcombine.high %v102_v20, %v102_v20  ;;  %v119_v24 = vpack.c.bf16 %v102_v20, %v102_v20  ;;  %65 = vst [vmem:[#allocation2] sm:$0x3] %v1303_v27  ;;  %v1204_v28 = vld [vmem:[#allocation8 + $0x30] sm:$0xff]  }
  0x40   :  { %1024 = vmatpush3.bf16.msra.mxu0 %v1163_v31  ;;  %v120_v25 = vpack.c.bf16 %v104_v23, %v104_v23  ;;  %v1207_v31 = vld [vmem:[#allocation8 + $0x18] sm:$0xff]  }
  0x41   :  { %1046 = vmatpush3.bf16.msra.mxu1 %v1164_v32  ;;  %1025 = vmatprep.subr.bf16.mxu0 %v1165_v33  ;;  %v1208_v32 = vld [vmem:[#allocation8 + $0x10] sm:$0xff]   ;;  %v1209_v33 = vld [vmem:[#allocation8 + $0x8] sm:$0xff]  }
  0x42   :  { %1047 = vmatprep.subr.bf16.mxu1 %v1166_v34  ;;  %v1210_v34 = vld [vmem:[#allocation8] sm:$0xff]  }
  0x44   :  { %1026 = vmatpush3.bf16.msra.mxu0 %v1167_v36 }
  0x45   :  { %1048 = vmatpush3.bf16.msra.mxu1 %v1168_v37  ;;  %1055 = vmatprep.subr.bf16.mxu0 %v1170_v41 }
  0x46   :  { %1077 = vmatprep.subr.bf16.mxu1 %v1171_v42 }
  0x47   :  { %666 = vmatmul.mubr.bf16.vlgmr.msra.gmra.mxu0 %v113_v45 }
  0x48   :  { %1056 = vmatpush3.bf16.msra.mxu0 %v1172_v46  ;;  %706 = vmatmul.mubr.bf16.vlgmr.msra.gmra.mxu1 %v115_v50 }
  0x49   :  { %1057 = vmatprep.subr.bf16.mxu0 %v1174_v51  ;;  %1078 = vmatpush3.bf16.msra.mxu1 %v1173_v49 }
  0x4a   :  { %1079 = vmatprep.subr.bf16.mxu1 %v1175_v53  ;;  %745 = vmatprep.mubr.bf16.mxu0 %v118_v22 }
  0x4b   :  { %785 = vmatprep.mubr.bf16.mxu1 %v120_v25 }
  0x4c   :  { %1058 = vmatpush3.bf16.msra.mxu0 %v1176_v54  ;;  %v66_v54 = vld [vmem:[#allocation2] sm:$0x3] }
  0x4d   :  { %1059 = vmatprep.subr.bf16.mxu0 %v1178_v56  ;;  %1080 = vmatpush3.bf16.msra.mxu1 %v1177_v55 }
  0x4e   :  { %1081 = vmatprep.subr.bf16.mxu1 %v1179_v57 }
  0x50   :  { %1060 = vmatpush3.bf16.msra.mxu0 %v1180_v58 }
  0x51   :  { %1061 = vmatprep.subr.bf16.mxu0 %v1182_v60  ;;  %1082 = vmatpush3.bf16.msra.mxu1 %v1181_v59  ;;  %v1001_v60 = vld [vmem:[%s1362_s2] ss:$0 sm:$0xff] }
  0x52   :  { %1083 = vmatprep.subr.bf16.mxu1 %v1183_v61 }
  0x54   :  { %1062 = vmatpush3.bf16.msra.mxu0 %v1184_v62 }
  0x55   :  { %1063 = vmatprep.subr.bf16.mxu0 %v1186_v0  ;;  %1084 = vmatpush3.bf16.msra.mxu1 %v1185_v63 }
  0x56   :  { %1085 = vmatprep.subr.bf16.mxu1 %v1187_v1  ;;  %v1002_v1 = vld [vmem:[%s1364_s4] ss:$0 sm:$0xff] }
  0x58   :  { %1064 = vmatpush3.bf16.msra.mxu0 %v1188_v2 }
  0x59   :  { %1065 = vmatprep.subr.bf16.mxu0 %v1190_v4  ;;  %1086 = vmatpush3.bf16.msra.mxu1 %v1189_v3 }
  0x5a   :  { %1087 = vmatprep.subr.bf16.mxu1 %v1191_v5 }
  0x5c   :  { %1066 = vmatpush3.bf16.msra.mxu0 %v1192_v6 }
  0x5d   :  { %1067 = vmatprep.subr.bf16.mxu0 %v1194_v8  ;;  %1088 = vmatpush3.bf16.msra.mxu1 %v1193_v7 }
  0x5e   :  { %1089 = vmatprep.subr.bf16.mxu1 %v1195_v9 }
  0x60   :  { %1068 = vmatpush3.bf16.msra.mxu0 %v1196_v10 }
  0x61   :  { %1069 = vmatprep.subr.bf16.mxu0 %v1198_v12  ;;  %1090 = vmatpush3.bf16.msra.mxu1 %v1197_v11 }
  0x62   :  { %1091 = vmatprep.subr.bf16.mxu1 %v1199_v13 }
  0x64   :  { %1070 = vmatpush3.bf16.msra.mxu0 %v1200_v14 }
  0x65   :  { %1092 = vmatpush3.bf16.msra.mxu1 %v1201_v16  ;;  %1108 = vmatprep.subr.bf16.mxu0 %v1303_v27 }
  0x67   :  { %746 = vmatmul.mubr.bf16.vlgmr.msra.gmra.mxu0 %v117_v21 }
  0x68   :  { %786 = vmatmul.mubr.bf16.vlgmr.msra.gmra.mxu1 %v119_v24  ;;  %1109 = vmatpush3.bf16.msra.mxu0 %v1203_v26 }
  0x69   :  { %1110 = vmatprep.subr.bf16.mxu0 %v1303_v27  ;;  %1124 = vmatprep.mubr.msk.bf16.mxu0 %vm1304_vm0, %v1303_v27 }
  0x6c   :  { %1111 = vmatpush3.bf16.msra.mxu0 %v1204_v28 }
  0x6d   :  { %1112 = vmatprep.subr.bf16.mxu0 %v1303_v27 }
  0x70   :  { %1113 = vmatpush3.bf16.msra.mxu0 %v1205_v29 }
  0x71   :  { %1114 = vmatprep.subr.bf16.mxu0 %v1303_v27 }
  0x74   :  { %1115 = vmatpush3.bf16.msra.mxu0 %v1206_v30 }
  0x75   :  { %1116 = vmatprep.subr.bf16.mxu0 %v1303_v27 }
  0x78   :  { %1117 = vmatpush3.bf16.msra.mxu0 %v1207_v31 }
  0x79   :  { %1118 = vmatprep.subr.bf16.mxu0 %v1303_v27 }
  0x7c   :  { %1119 = vmatpush3.bf16.msra.mxu0 %v1208_v32 }
  0x7d   :  { %1120 = vmatprep.subr.bf16.mxu0 %v1303_v27 }
  0x80   :  { %1121 = vmatpush3.bf16.msra.mxu0 %v1209_v33 }
  0x81   :  { %1122 = vmatprep.subr.bf16.mxu0 %v1303_v27 }
  0x84   :  { %1123 = vmatpush3.bf16.msra.mxu0 %v1210_v34 }
 0x107   :  { %v1027_v35 = vpop.f32.mrf.mxu0 }
 0x108   :  { %v1049_v36 = vpop.f32.mrf.mxu1 }
 0x109   :  { %v1028_v37 = vpop.f32.mrf.mxu0 }
 0x10a   :  { %v1050_v38 = vpop.f32.mrf.mxu1  ;;  %v1029_v43 = vadd.f32 %v1028_v37, %v1027_v35 }
 0x10b   :  { %v1030_v39 = vpop.f32.mrf.mxu0  ;;  %v1051_v44 = vadd.f32 %v1050_v38, %v1049_v36 }
 0x10c   :  { %v1052_v40 = vpop.f32.mrf.mxu1 }
 0x10d   :  { %v1031_v41 = vpop.f32.mrf.mxu0  ;;  %v708_v48 = vadd.f32 %v1051_v44, %v1029_v43 }
 0x10e   :  { %v1053_v42 = vpop.f32.mrf.mxu1 }
 0x127   :  { %v1071_v45 = vpop.f32.mrf.mxu0 }
 0x128   :  { %v1093_v46 = vpop.f32.mrf.mxu1 }
 0x129   :  { %v1072_v47 = vpop.f32.mrf.mxu0 }
 0x12a   :  { %v1073_v49 = vadd.f32 %v1072_v47, %v1071_v45  ;;  %v1094_v50 = vpop.f32.mrf.mxu1 }
 0x12b   :  { %v1074_v51 = vpop.f32.mrf.mxu0  ;;  %v1095_v53 = vadd.f32 %v1094_v50, %v1093_v46 }
 0x12c   :  { %v748_v52 = vadd.f32 %v1073_v49, %v708_v48  ;;  %v1096_v55 = vpop.f32.mrf.mxu1 }
 0x12d   :  { %v1075_v56 = vpop.f32.mrf.mxu0 }
 0x12e   :  { %v788_v57 = vadd.f32 %v1095_v53, %v748_v52  ;;  %v1097_v58 = vpop.f32.mrf.mxu1 }
 0x130   :  { %v793_v59 = vadd.f32 %v788_v57, %v66_v54 }
 0x132   :  { %794 = vst [vmem:[#allocation2] sm:$0x3] %v793_v59 }
 0x139   :  { %v798_v61 = vld [vmem:[#allocation2] sm:$0x3] }
 0x13a   :  { %v806_v62 = vadd.f32 %v1001_v60, %v798_v61 }
 0x13c   :  { %v807_v63 = vmax.f32 %v806_v62, 0.0 }
 0x13e   :  { %v808_v0 = vpack.c.bf16 %v807_v63, %v807_v63 }
 0x140   :  { %1125 = vmatmul.mubr.bf16.vlgmr.msra.gmra.mxu0 %v808_v0 }
 0x200   :  { %v914_v2 = vpop.f32.mrf.mxu0 }
 0x201   :  { %v915_v3 = vadd.f32 %v1002_v1, %v914_v2 }
 0x202   :  { %v1126_v4 = vpop.f32.mrf.mxu0 }
 0x203   :  { %920 = vst [vmem:[#allocation9] sm:$0x3] %v915_v3 }
 0x204   :  { %v917_v5 = vpop.f32.mrf.mxu0 }
 0x205   :  { %1282 = shalt.err (!%p1279_p5)
}
 0x206   :  { %930 = dma.vmem_to_hbm [thread:$0]  %s928_s12, 32, %s1365_s5, [#allocation5]   ;;  %v1127_v6 = vpop.f32.mrf.mxu0 }
 0x207   :  { %1295 = dma.done.wait [#allocation5], 32  }
 0x208   :  { %1296 = vsyncadd [#allocation5], 4294967264 }
 0x209   :  { %934 = vsyncpa [#allocation4], 1 }
 0x20a   :  { %935 = vsyncpa [#allocation7], 1 }
 0x20b   :  { %936 = vsyncpa [#allocation5], 1 }

</bundles_post_ra>
